<compile_context>
chip_gen: v5e
topology: v5e:2x2
jax: 0.10.0
libtpu: 0.0.40
codegen_flags: <defaults>
</compile_context>

<pallas_src>
import math
import jax
import jax.numpy as jnp
from jax.experimental import pallas as pl
from jax.experimental.pallas import tpu as pltpu


def _round_up(n, m):
    return ((n + m - 1) // m) * m


# ----------------------------------------------------------------------------
# Fused forward kernel (one batch tile per grid step):
#   Encoder2 :  h1  = LeakyReLU(x  @ W1' + b1')        [TB, layer1]
#               enc = h1 @ W2' + b2'                   [TB, layer2]
#   Decoder2 :  x1  = ReLU(enc @ Wd1' + bd1')          [TB, layer1]
#               [x1 | x2] = x1 @ [I | Wd2] + [0 | bd2] [TB, layer1 + in_dim]
# (W', b' are the Linear+BatchNorm-folded weights/biases.)
# ----------------------------------------------------------------------------
def ae3_kernel(x_ref,
               w1_ref, b1_ref,
               w2_ref, b2_ref,
               wd1_ref, bd1_ref,
               wd2e_ref, bd2e_ref,
               enc_ref, rec_ref):
    bf16, f32 = jnp.bfloat16, jnp.float32
    x = x_ref[...]

    # Encoder linear1 (+BN folded) -> (Dropout: identity) -> LeakyReLU(0.01)
    h1 = jnp.dot(x.astype(bf16), w1_ref[...],
                 preferred_element_type=f32) + b1_ref[...]
    h1 = jnp.where(h1 > 0, h1, 0.01 * h1)

    # Encoder linear2 (+BN folded)  == enc (bottleneck)
    enc = jnp.dot(h1.astype(bf16), w2_ref[...],
                  preferred_element_type=f32) + b2_ref[...]
    enc_ref[...] = enc

    # Decoder linear1 (+BN folded) -> (Dropout: identity) -> ReLU  == x1
    d1 = jnp.dot(enc.astype(bf16), wd1_ref[...],
                 preferred_element_type=f32) + bd1_ref[...]
    d1 = jnp.maximum(d1, 0.0)

    # Decoder linear2, fused with the x1 passthrough:
    #   [x1 | x2] = d1 @ [I_layer1 | Wd2] + [0 | bd2]
    # -> single lane-dense store of the whole reconstruction slab.
    rec_ref[...] = (jnp.dot(d1.astype(bf16), wd2e_ref[...],
                            preferred_element_type=f32) + bd2e_ref[...])


# ----------------------------------------------------------------------------
# Wrapper: AutoEncoder3.forward semantics for the implemented configuration.
# Returns [enc, rec, zinb_loss, kl] like the PyTorch module.
# ----------------------------------------------------------------------------
def autoencoder3_forward(x, to_rec, params, batches=None, *, batch_tile=128):
    del to_rec, batches  # zinb=False / conditional=False: unused on this path

    B, in_dim = x.shape
    layer1 = params["w2"].shape[0]
    layer2 = params["w2"].shape[1]
    rec_dim = params["wd2_ext"].shape[1]          # layer1 + in_dim

    # Batch tiling: whole (sublane-padded) batch if small, else `batch_tile` rows.
    tb = min(batch_tile, _round_up(B, 8))
    b_pad = _round_up(B, tb)
    if b_pad != B:
        x = jnp.pad(x, ((0, b_pad - B), (0, 0)))

    batch_spec = lambda feat: pl.BlockSpec((tb, feat), lambda i: (i, 0))
    resident = lambda shape: pl.BlockSpec(shape, lambda i: (0, 0))  # weights stay put

    enc_p, rec_p = pl.pallas_call(
        ae3_kernel,
        out_shape=(jax.ShapeDtypeStruct((b_pad, layer2), jnp.float32),
                   jax.ShapeDtypeStruct((b_pad, rec_dim), jnp.float32)),
        grid=(pl.cdiv(b_pad, tb),),
        in_specs=[
            batch_spec(in_dim),
            resident(params["w1"].shape), resident(params["b1"].shape),
            resident(params["w2"].shape), resident(params["b2"].shape),
            resident(params["wd1"].shape), resident(params["bd1"].shape),
            resident(params["wd2_ext"].shape), resident(params["bd2_ext"].shape),
        ],
        out_specs=(batch_spec(layer2), batch_spec(rec_dim)),
        compiler_params=pltpu.CompilerParams(
            dimension_semantics=("parallel",)),   # batch tiles shard across TCs (v7x)
    )(x,
      params["w1"], params["b1"], params["w2"], params["b2"],
      params["wd1"], params["bd1"], params["wd2_ext"], params["bd2_ext"])

    enc = enc_p[:B]
    x1 = rec_p[:B, :layer1]
    x2 = rec_p[:B, layer1:]

    rec = {"mean": [x1, x2]}                      # Decoder2 returns [x1, x2]
    zinb_loss = jnp.zeros((1,), jnp.float32)      # zinb=False        -> Tensor([0])
    kl = jnp.zeros((1,), jnp.float32)             # variational=False -> Tensor([0])
    return [enc, rec, zinb_loss, kl]


# ----------------------------------------------------------------------------
# Deterministic parameter construction (kaiming_uniform_ weights, zero biases,
# identity BatchNorm running stats as after nn.BatchNorm1d.__init__), with the
# BN folded into the Linear weights and the decoder's x1 passthrough fused
# into an extended decoder-linear2 weight.
# ----------------------------------------------------------------------------
def kaiming_uniform(key, fan_in, fan_out):
    # nn.init.kaiming_uniform_ (a=0, fan_in mode) on the torch [out, in] weight,
    # stored here pre-transposed as [in, out].
    bound = math.sqrt(6.0 / fan_in)
    return jax.random.uniform(key, (fan_in, fan_out), jnp.float32, -bound, bound)


def fold_bn(w, b, eps=1e-5):
    """Fold an eval-mode BatchNorm1d (gamma=1, beta=0, mean=0, var=1) into the
    preceding Linear: W' = W*scale, b' = b*scale + shift."""
    n = w.shape[1]
    gamma = jnp.ones((n,), jnp.float32)
    beta = jnp.zeros((n,), jnp.float32)
    mean = jnp.zeros((n,), jnp.float32)
    var = jnp.ones((n,), jnp.float32)
    scale = gamma / jnp.sqrt(var + eps)
    shift = beta - mean * scale
    return w * scale[None, :], b * scale + shift


def make_params(key, in_dim, layer1, layer2):
    k1, k2, k3, k4 = jax.random.split(key, 4)
    bf16 = jnp.bfloat16

    # Encoder2
    w1, b1 = fold_bn(kaiming_uniform(k1, in_dim, layer1),
                     jnp.zeros((layer1,), jnp.float32))
    w2, b2 = fold_bn(kaiming_uniform(k2, layer1, layer2),
                     jnp.zeros((layer2,), jnp.float32))
    # Decoder2 (conditional=False -> n_batches=0 path)
    wd1, bd1 = fold_bn(kaiming_uniform(k3, layer2, layer1),
                       jnp.zeros((layer1,), jnp.float32))
    wd2 = kaiming_uniform(k4, layer1, in_dim)     # no BN on decoder linear2
    bd2 = jnp.zeros((in_dim,), jnp.float32)

    # Fuse x1 passthrough with decoder linear2: [x1|x2] = d1 @ [I | Wd2] + [0 | bd2]
    wd2_ext = jnp.concatenate([jnp.eye(layer1, dtype=jnp.float32), wd2], axis=1)
    bd2_ext = jnp.concatenate([jnp.zeros((layer1,), jnp.float32), bd2])

    return {
        "w1": w1.astype(bf16), "b1": b1.reshape(1, -1),
        "w2": w2.astype(bf16), "b2": b2.reshape(1, -1),
        "wd1": wd1.astype(bf16), "bd1": bd1.reshape(1, -1),
        "wd2_ext": wd2_ext.astype(bf16), "bd2_ext": bd2_ext.reshape(1, -1),
    }


# Pure-JAX reference replicating the kernel arithmetic (bf16 matmul inputs,
# f32 accumulation) for a correctness check.
def reference_forward(x, p):
    bf16, f32 = jnp.bfloat16, jnp.float32
    mm = lambda a, w: jnp.dot(a.astype(bf16), w, preferred_element_type=f32)
    h1 = mm(x, p["w1"]) + p["b1"]
    h1 = jnp.where(h1 > 0, h1, 0.01 * h1)
    enc = mm(h1, p["w2"]) + p["b2"]
    d1 = jnp.maximum(mm(enc, p["wd1"]) + p["bd1"], 0.0)
    rec = mm(d1, p["wd2_ext"]) + p["bd2_ext"]
    layer1 = p["wd1"].shape[1]
    return enc, rec[:, :layer1], rec[:, layer1:]


if __name__ == "__main__":
    # Small shapes consistent with the module:
    #   in_shape=64, n_meta=0, layers={'layer1': 64, 'layer2': 32}, n_batches=2.
    # Reconstruction slab width = layer1 + in_dim = 128 (lane-dense output);
    # B=256 with 128-row batch tiles -> grid of 2 ("parallel").
    B, in_shape, n_meta = 256, 64, 0
    layer1, layer2, n_batches = 64, 32, 2
    in_dim = in_shape + n_meta

    key = jax.random.PRNGKey(0)
    kx, kb, kp = jax.random.split(key, 3)
    x = jax.random.normal(kx, (B, in_dim), jnp.float32)
    to_rec = x                                    # unused (zinb=False)
    batches = jax.random.randint(kb, (B,), 0, n_batches + 1)  # unused (conditional=False)
    params = make_params(kp, in_dim, layer1, layer2)

    enc, rec, zinb_loss, kl = autoencoder3_forward(x, to_rec, params, batches)
    x1, x2 = rec["mean"]
    jax.block_until_ready((enc, x1, x2, zinb_loss, kl))

    enc_r, x1_r, x2_r = reference_forward(x, params)
    assert jnp.allclose(enc, enc_r, atol=1e-2, rtol=1e-2)
    assert jnp.allclose(x1, x1_r, atol=1e-2, rtol=1e-2)
    assert jnp.allclose(x2, x2_r, atol=1e-2, rtol=1e-2)

    # TODO(synk): variational (GaussianSample), mapper, tied_weights and zinb
    # branches of forward() are not exercised by this configuration and are not
    # implemented.
    print("KERNEL_OK")
</pallas_src>

<mosaic_0001>
module attributes {stable_mosaic.version = 11 : i64} {
  func.func @ae3_kernel(%arg0: i32, %arg1: memref<128x64xf32, #tpu.memory_space<vmem>>, %arg2: memref<64x64xbf16, #tpu.memory_space<vmem>>, %arg3: memref<1x64xf32, #tpu.memory_space<vmem>>, %arg4: memref<64x32xbf16, #tpu.memory_space<vmem>>, %arg5: memref<1x32xf32, #tpu.memory_space<vmem>>, %arg6: memref<32x64xbf16, #tpu.memory_space<vmem>>, %arg7: memref<1x64xf32, #tpu.memory_space<vmem>>, %arg8: memref<64x128xbf16, #tpu.memory_space<vmem>>, %arg9: memref<1x128xf32, #tpu.memory_space<vmem>>, %arg10: memref<128x32xf32, #tpu.memory_space<vmem>>, %arg11: memref<128x128xf32, #tpu.memory_space<vmem>>) attributes {dimension_semantics = [#tpu.dimension_semantics<parallel>], iteration_bounds = array<i64: 2>, scalar_prefetch = 0 : i64, scratch_operands = 0 : i64, tpu.core_type = #tpu.core_type<tc>, window_params = [{transform_indices = @transform_0, window_bounds = array<i64: 128, 64>}, {pipeline_mode = #tpu.pipeline_mode<synchronous>, transform_indices = @transform_1, window_bounds = array<i64: 64, 64>}, {pipeline_mode = #tpu.pipeline_mode<synchronous>, transform_indices = @transform_2, window_bounds = array<i64: 1, 64>}, {pipeline_mode = #tpu.pipeline_mode<synchronous>, transform_indices = @transform_3, window_bounds = array<i64: 64, 32>}, {pipeline_mode = #tpu.pipeline_mode<synchronous>, transform_indices = @transform_4, window_bounds = array<i64: 1, 32>}, {pipeline_mode = #tpu.pipeline_mode<synchronous>, transform_indices = @transform_5, window_bounds = array<i64: 32, 64>}, {pipeline_mode = #tpu.pipeline_mode<synchronous>, transform_indices = @transform_6, window_bounds = array<i64: 1, 64>}, {pipeline_mode = #tpu.pipeline_mode<synchronous>, transform_indices = @transform_7, window_bounds = array<i64: 64, 128>}, {pipeline_mode = #tpu.pipeline_mode<synchronous>, transform_indices = @transform_8, window_bounds = array<i64: 1, 128>}, {transform_indices = @transform_9, window_bounds = array<i64: 128, 32>}, {transform_indices = @transform_10, window_bounds = array<i64: 128, 128>}]} {
    %c0 = arith.constant 0 : index
    %c0_0 = arith.constant 0 : index
    %0 = vector.load %arg1[%c0, %c0_0] : memref<128x64xf32, #tpu.memory_space<vmem>>, vector<128x64xf32>
    %1 = arith.truncf %0 : vector<128x64xf32> to vector<128x64xbf16>
    %c0_1 = arith.constant 0 : index
    %c0_2 = arith.constant 0 : index
    %2 = vector.load %arg2[%c0_1, %c0_2] : memref<64x64xbf16, #tpu.memory_space<vmem>>, vector<64x64xbf16>
    %cst = arith.constant dense<0.000000e+00> : vector<128x64xf32>
    %3 = tpu.matmul %1, %2, %cst {dimension_numbers = #tpu.dot_dimension_numbers<[1], [0], [0], [1], [0, 0, 1, 1], [], []>} : vector<128x64xbf16>, vector<64x64xbf16>, vector<128x64xf32> -> vector<128x64xf32>
    %c0_3 = arith.constant 0 : index
    %c0_4 = arith.constant 0 : index
    %4 = vector.load %arg3[%c0_3, %c0_4] : memref<1x64xf32, #tpu.memory_space<vmem>>, vector<1x64xf32>
    %5 = vector.broadcast %4 : vector<1x64xf32> to vector<128x64xf32>
    %6 = arith.addf %3, %5 : vector<128x64xf32>
    %cst_5 = arith.constant 0.000000e+00 : f32
    %7 = vector.broadcast %cst_5 : f32 to vector<128x64xf32>
    %8 = arith.cmpf ogt, %6, %7 : vector<128x64xf32>
    %cst_6 = arith.constant 0.00999999977 : f32
    %9 = vector.broadcast %cst_6 : f32 to vector<128x64xf32>
    %10 = arith.mulf %9, %6 : vector<128x64xf32>
    %11 = arith.select %8, %6, %10 : vector<128x64xi1>, vector<128x64xf32>
    %12 = arith.truncf %11 : vector<128x64xf32> to vector<128x64xbf16>
    %c0_7 = arith.constant 0 : index
    %c0_8 = arith.constant 0 : index
    %13 = vector.load %arg4[%c0_7, %c0_8] : memref<64x32xbf16, #tpu.memory_space<vmem>>, vector<64x32xbf16>
    %cst_9 = arith.constant dense<0.000000e+00> : vector<128x32xf32>
    %14 = tpu.matmul %12, %13, %cst_9 {dimension_numbers = #tpu.dot_dimension_numbers<[1], [0], [0], [1], [0, 0, 1, 1], [], []>} : vector<128x64xbf16>, vector<64x32xbf16>, vector<128x32xf32> -> vector<128x32xf32>
    %c0_10 = arith.constant 0 : index
    %c0_11 = arith.constant 0 : index
    %15 = vector.load %arg5[%c0_10, %c0_11] : memref<1x32xf32, #tpu.memory_space<vmem>>, vector<1x32xf32>
    %16 = vector.broadcast %15 : vector<1x32xf32> to vector<128x32xf32>
    %17 = arith.addf %14, %16 : vector<128x32xf32>
    %c0_12 = arith.constant 0 : index
    %c0_13 = arith.constant 0 : index
    %18 = vector.load %arg10[%c0_12, %c0_13] : memref<128x32xf32, #tpu.memory_space<vmem>>, vector<128x32xf32>
    tpu.vector_store %arg10[%c0_12, %c0_13], %17 {strides = array<i32>} : memref<128x32xf32, #tpu.memory_space<vmem>>, vector<128x32xf32>,
    %19 = arith.truncf %17 : vector<128x32xf32> to vector<128x32xbf16>
    %c0_14 = arith.constant 0 : index
    %c0_15 = arith.constant 0 : index
    %20 = vector.load %arg6[%c0_14, %c0_15] : memref<32x64xbf16, #tpu.memory_space<vmem>>, vector<32x64xbf16>
    %cst_16 = arith.constant dense<0.000000e+00> : vector<128x64xf32>
    %21 = tpu.matmul %19, %20, %cst_16 {dimension_numbers = #tpu.dot_dimension_numbers<[1], [0], [0], [1], [0, 0, 1, 1], [], []>} : vector<128x32xbf16>, vector<32x64xbf16>, vector<128x64xf32> -> vector<128x64xf32>
    %c0_17 = arith.constant 0 : index
    %c0_18 = arith.constant 0 : index
    %22 = vector.load %arg7[%c0_17, %c0_18] : memref<1x64xf32, #tpu.memory_space<vmem>>, vector<1x64xf32>
    %23 = vector.broadcast %22 : vector<1x64xf32> to vector<128x64xf32>
    %24 = arith.addf %21, %23 : vector<128x64xf32>
    %cst_19 = arith.constant 0.000000e+00 : f32
    %25 = vector.broadcast %cst_19 : f32 to vector<128x64xf32>
    %26 = arith.maximumf %24, %25 : vector<128x64xf32>
    %27 = arith.truncf %26 : vector<128x64xf32> to vector<128x64xbf16>
    %c0_20 = arith.constant 0 : index
    %c0_21 = arith.constant 0 : index
    %28 = vector.load %arg8[%c0_20, %c0_21] : memref<64x128xbf16, #tpu.memory_space<vmem>>, vector<64x128xbf16>
    %cst_22 = arith.constant dense<0.000000e+00> : vector<128x128xf32>
    %29 = tpu.matmul %27, %28, %cst_22 {dimension_numbers = #tpu.dot_dimension_numbers<[1], [0], [0], [1], [0, 0, 1, 1], [], []>} : vector<128x64xbf16>, vector<64x128xbf16>, vector<128x128xf32> -> vector<128x128xf32>
    %c0_23 = arith.constant 0 : index
    %c0_24 = arith.constant 0 : index
    %30 = vector.load %arg9[%c0_23, %c0_24] : memref<1x128xf32, #tpu.memory_space<vmem>>, vector<1x128xf32>
    %31 = vector.broadcast %30 : vector<1x128xf32> to vector<128x128xf32>
    %32 = arith.addf %29, %31 : vector<128x128xf32>
    %c0_25 = arith.constant 0 : index
    %c0_26 = arith.constant 0 : index
    %33 = vector.load %arg11[%c0_25, %c0_26] : memref<128x128xf32, #tpu.memory_space<vmem>>, vector<128x128xf32>
    tpu.vector_store %arg11[%c0_25, %c0_26], %32 {strides = array<i32>} : memref<128x128xf32, #tpu.memory_space<vmem>>, vector<128x128xf32>,
    return
  }
  func.func @transform_0(%arg0: i32) -> (i32, i32) {
    %c0_i32 = arith.constant 0 : i32
    %c0_i32_0 = arith.constant 0 : i32
    return %arg0, %c0_i32 : i32, i32
  }
  func.func @transform_1(%arg0: i32) -> (i32, i32) {
    %c0_i32 = arith.constant 0 : i32
    %c0_i32_0 = arith.constant 0 : i32
    %c0_i32_1 = arith.constant 0 : i32
    return %c0_i32, %c0_i32_0 : i32, i32
  }
  func.func @transform_2(%arg0: i32) -> (i32, i32) {
    %c0_i32 = arith.constant 0 : i32
    %c0_i32_0 = arith.constant 0 : i32
    %c0_i32_1 = arith.constant 0 : i32
    return %c0_i32, %c0_i32_0 : i32, i32
  }
  func.func @transform_3(%arg0: i32) -> (i32, i32) {
    %c0_i32 = arith.constant 0 : i32
    %c0_i32_0 = arith.constant 0 : i32
    %c0_i32_1 = arith.constant 0 : i32
    return %c0_i32, %c0_i32_0 : i32, i32
  }
  func.func @transform_4(%arg0: i32) -> (i32, i32) {
    %c0_i32 = arith.constant 0 : i32
    %c0_i32_0 = arith.constant 0 : i32
    %c0_i32_1 = arith.constant 0 : i32
    return %c0_i32, %c0_i32_0 : i32, i32
  }
  func.func @transform_5(%arg0: i32) -> (i32, i32) {
    %c0_i32 = arith.constant 0 : i32
    %c0_i32_0 = arith.constant 0 : i32
    %c0_i32_1 = arith.constant 0 : i32
    return %c0_i32, %c0_i32_0 : i32, i32
  }
  func.func @transform_6(%arg0: i32) -> (i32, i32) {
    %c0_i32 = arith.constant 0 : i32
    %c0_i32_0 = arith.constant 0 : i32
    %c0_i32_1 = arith.constant 0 : i32
    return %c0_i32, %c0_i32_0 : i32, i32
  }
  func.func @transform_7(%arg0: i32) -> (i32, i32) {
    %c0_i32 = arith.constant 0 : i32
    %c0_i32_0 = arith.constant 0 : i32
    %c0_i32_1 = arith.constant 0 : i32
    return %c0_i32, %c0_i32_0 : i32, i32
  }
  func.func @transform_8(%arg0: i32) -> (i32, i32) {
    %c0_i32 = arith.constant 0 : i32
    %c0_i32_0 = arith.constant 0 : i32
    %c0_i32_1 = arith.constant 0 : i32
    return %c0_i32, %c0_i32_0 : i32, i32
  }
  func.func @transform_9(%arg0: i32) -> (i32, i32) {
    %c0_i32 = arith.constant 0 : i32
    %c0_i32_0 = arith.constant 0 : i32
    return %arg0, %c0_i32 : i32, i32
  }
  func.func @transform_10(%arg0: i32) -> (i32, i32) {
    %c0_i32 = arith.constant 0 : i32
    %c0_i32_0 = arith.constant 0 : i32
    return %arg0, %c0_i32 : i32, i32
  }
}

</mosaic_0001>

<bundles_post_ra>
// kernel: tpu_custom_call.1
= control target key start
LH: loop header
LB: loop body
LE: loop exit
PB: predicated region body
PF: predicated region fallthrough
CT: control target
= control target key end

     0   :  { %16 = vsyncpa [#allocation3], 0  ;;  %s1628_s0 = inlined_call_operand.vmem [shape: f32[256,64], index: 0, kind: input, shape index: {}]   ;;  %s1629_s1 = inlined_call_operand.vmem [shape: bf16[64,64], index: 1, kind: input, shape index: {}]   ;;  %s1630_s2 = inlined_call_operand.vmem [shape: f32[1,64], index: 2, kind: input, shape index: {}]   ;;  %s1631_s3 = inlined_call_operand.vmem [shape: bf16[64,32], index: 3, kind: input, shape index: {}]   ;;  %s1632_s4 = inlined_call_operand.vmem [shape: f32[1,32], index: 4, kind: input, shape index: {}]   ;;  %s1633_s5 = inlined_call_operand.vmem [shape: bf16[32,64], index: 5, kind: input, shape index: {}]   ;;  %s1634_s6 = inlined_call_operand.vmem [shape: f32[1,64], index: 6, kind: input, shape index: {}]   ;;  %s1635_s7 = inlined_call_operand.vmem [shape: bf16[64,128], index: 7, kind: input, shape index: {}]   ;;  %s1636_s8 = inlined_call_operand.vmem [shape: f32[1,128], index: 8, kind: input, shape index: {}]   ;;  %s1637_s9 = inlined_call_operand.vmem [shape: f32[256,32], index: 9, kind: output, shape index: {0}]   ;;  %s1638_s10 = inlined_call_operand.hbm [shape: f32[256,128], index: 10, kind: output, shape index: {1}]  }
   0x1   :  { %18 = vsyncpa [#allocation3 + $0x1], 0  ;;  %s1337_s13 = smov 0   ;;  %s1339_s14 = smov 0  }
   0x2   :  { %s1341_s15 = smov 0   ;;  %s1343_s16 = smov 0  }
   0x3 LB: > { %s1358_s17 = sadd.s32 4294967295, %s1278_s16   ;;  %s1054_s18 = sadd.s32 4294967294, %s1278_s16   ;;  %s1278_s16 = sphi %s1343_s16, %s1644_s16   ;;  %s1274_s15 = sphi %s1341_s15, %s1643_s15   ;;  %s1270_s14 = sphi %s1339_s14, %s1642_s14   ;;  %s1266_s13 = sphi %s1337_s13, %s1641_s13  }
   0x4   : > { %s1362_s19 = sadd.s32 1, %s1278_s16   ;;  %s251_s20 = sadd.s32 1, %s1274_s15 }
   0x5   : > { %s248_s21 = ssub.s32 %s1278_s16, %s1362_s19  ;;  %p261_p0 = scmp.ne.s32.totalorder %s1274_s15, %s1270_s14 }
   0x6   : > { %p249_p1 = scmp.eq.s32.totalorder %s248_s21, 0  ;;  %p262_p2 = scmp.eq.s32.totalorder %s1358_s17, 1 }
   0x7   : > { %p267_p3 = scmp.ne.s32.totalorder %s1270_s14, %s1266_s13  ;;  %p268_p4 = scmp.eq.s32.totalorder %s1054_s18, 1 }
   0x8   : > { %s1373_s22 = scalar_select %p249_p1, %s1274_s15, %s251_s20  }
   0x9   : > { %p1375_p5 = por %p262_p2, %p261_p0  ;;  %p1379_p6 = por %p268_p4, %p267_p3 }
   0xa   : > { %p1057_p7 = scmp.ge.s32.totalorder %s1278_s16, 1  ;;  %p319_p8 = scmp.lt.s32.totalorder %s1278_s16, 3 }
   0xc   : > { %p320_p9 = pnand %p1057_p7, %p319_p8 }
   0xd   : > { %s1059_s27 = sshll.u32 (!%p320_p9), %s1358_s17, 4  ;;  %s1170_s12 = sshll.u32 (!%p320_p9), %s1358_s17, 7 }
   0xe   : > { %323 = sbr.rel (%p320_p9) target bundleno = 718 (0x2ce), region = 56  ;;  %p363_p10 = scmp.lt.s32.totalorder (!%p320_p9), %s1059_s27, 31 }
   0xf   : > { %s963_s25 = scalar_lea.hbm (!%p320_p9), %s1638_s10, %s1170_s12  ;;  %s1236_s12 = scalar_lea.hbm (!%p320_p9), %s1638_s10, 256 }
  0x10   : > { %s966_s28 = sshll.u32 (!%p320_p9), %s963_s25, 4  ;;  %s967_s28 = int_to_ptr.hbm [resolvable:$true] %s966_s28 }
  0x13   : > { %v1159_v0 = vld [vmem:[%s1629_s1 + $0x18] sm:$0xff]  ;;  %v1158_v1 = vld [vmem:[%s1629_s1 + $0x10] sm:$0xff]  ;;  %s1646_s27 = smov (!%p363_p10, %s1059_s27), 31  ;;  %v1157_v2 = vld [vmem:[%s1629_s1 + $0x8] sm:$0xff]  ;;  %vm436_vm0 = vcmask 523264  }
  0x14   : > { %465 = vmatpush.bf16.msra.mxu0 %v1159_v0  ;;  %s1060_s30 = sshll.u32 %s1646_s27, 3  ;;  %v1156_v3 = vld [vmem:[%s1629_s1] sm:$0xff]  ;;  %v1163_v25 = vld [vmem:[%s1631_s3 + $0x18] sm:$0xff]  ;;  %v1162_v26 = vld [vmem:[%s1631_s3 + $0x10] sm:$0xff] }
  0x15   : > { %s1403_s21 = scalar_lea.vmem %s1628_s0, %s1060_s30  ;;  %630 = vmatpush.bf16.msra.mxu1 %v1163_v25  ;;  %v1161_v27 = vld [vmem:[%s1631_s3 + $0x8] sm:$0xff]  ;;  %v1160_v28 = vld [vmem:[%s1631_s3] sm:$0xff]  ;;  %s1489_s29 = scalar_lea.vmem %s1637_s9, %s1060_s30 }
  0x16   : > { %v376_v4 = vld [vmem:[%s1403_s21] sm:$0xff]  ;;  %v377_v5 = vld [vmem:[%s1403_s21 + $0x8] sm:$0xff]  ;;  %v378_v7 = vld [vmem:[%s1403_s21 + $0x10] sm:$0xff]  ;;  %s1230_s30 = sshra.s32 %s967_s28, 4  ;;  %s1231_s30 = int_to_ptr.hbm [resolvable:$true] %s1230_s30 }
  0x17   : > { %v392_v6 = vpack.c.bf16 %v377_v5, %v376_v4  ;;  %v379_v8 = vld [vmem:[%s1403_s21 + $0x18] sm:$0xff]  ;;  %v380_v10 = vld [vmem:[%s1403_s21 + $0x20] sm:$0xff]  ;;  %v381_v11 = vld [vmem:[%s1403_s21 + $0x28] sm:$0xff]  ;;  %s1232_s17 = scalar_lea.hbm %s1231_s30, 128  ;;  %p1237_p0 = scmp.lt.s32.totalorder %s1231_s30, %s1638_s10 }
  0x18   : > { %466 = vmatpush.bf16.msra.mxu0 %v1158_v1  ;;  %v393_v9 = vpack.c.bf16 %v379_v8, %v378_v7  ;;  %v394_v12 = vpack.c.bf16 %v381_v11, %v380_v10  ;;  %v382_v13 = vld [vmem:[%s1403_s21 + $0x30] sm:$0xff]  ;;  %v383_v14 = vld [vmem:[%s1403_s21 + $0x38] sm:$0xff]  ;;  %v384_v16 = vld [vmem:[%s1403_s21 + $0x40] sm:$0xff]  ;;  %p1233_p11 = scmp.ne.s32.totalorder %s1231_s30, %s1232_s17  ;;  %p1238_p1 = scmp.lt.s32.totalorder %s1236_s12, %s1232_s17 }
  0x19   : > { %v395_v15 = vpack.c.bf16 %v383_v14, %v382_v13  ;;  %v385_v17 = vld [vmem:[%s1403_s21 + $0x48] sm:$0xff]  ;;  %v386_v19 = vld [vmem:[%s1403_s21 + $0x50] sm:$0xff]  ;;  %v387_v20 = vld [vmem:[%s1403_s21 + $0x58] sm:$0xff]  ;;  %631 = vmatpush.bf16.msra.mxu1 %v1162_v26 }
  0x1a   : > { %v396_v18 = vpack.c.bf16 %v385_v17, %v384_v16  ;;  %v397_v21 = vpack.c.bf16 %v387_v20, %v386_v19  ;;  %v388_v22 = vld [vmem:[%s1403_s21 + $0x60] sm:$0xff]  ;;  %v389_v23 = vld [vmem:[%s1403_s21 + $0x68] sm:$0xff]  ;;  %v390_v29 = vld [vmem:[%s1403_s21 + $0x70] sm:$0xff]  ;;  %p1234_p12 = pnand %p1233_p11, %p1375_p5  ;;  %p1239_p2 = por %p1238_p1, %p1237_p0 }
  0x1b   : > { %v398_v24 = vpack.c.bf16 %v389_v23, %v388_v22  ;;  %v391_v30 = vld [vmem:[%s1403_s21 + $0x78] sm:$0xff]  ;;  %v1447_v33 = vld [vmem:[%s1630_s2] ss:$0 sm:$0xff] }
  0x1c   : > { %467 = vmatpush.bf16.msra.mxu0 %v1157_v2  ;;  %v399_v31 = vpack.c.bf16 %v391_v30, %v390_v29  ;;  %p1235_p13 = pneg %p1234_p12 }
  0x1d   : > { %632 = vmatpush.bf16.msra.mxu1 %v1161_v27 }
  0x1e   : > { %p1240_p3 = pnand %p1239_p2, %p1235_p13 }
  0x20   : > { %468 = vmatpush.bf16.msra.mxu0 %v1156_v3 }
  0x21   : > { %633 = vmatpush.bf16.msra.mxu1 %v1160_v28 }
  0x23   : > { %1079 = vmatmul.msk.bf16.vlgmr.msra.gmra.mxu0 %vm436_vm0, %v392_v6 }
  0x33   : > { %1080 = vmatmul.msk.bf16.gmra.mxu0 %vm436_vm0, %v393_v9 }
  0x43   : > { %1081 = vmatmul.msk.bf16.gmra.mxu0 %vm436_vm0, %v394_v12 }
  0x53   : > { %1082 = vmatmul.msk.bf16.gmra.mxu0 %vm436_vm0, %v395_v15 }
  0x63   : > { %1083 = vmatmul.msk.bf16.gmra.mxu0 %vm436_vm0, %v396_v18 }
  0x73   : > { %1084 = vmatmul.msk.bf16.gmra.mxu0 %vm436_vm0, %v397_v21 }
  0x83   : > { %1085 = vmatmul.msk.bf16.gmra.mxu0 %vm436_vm0, %v398_v24 }
  0x93   : > { %1086 = vmatmul.msk.bf16.gmra.mxu0 %vm436_vm0, %v399_v31 }
  0xa0   : > { %v470_v32 = vpop.f32.mrf.mxu0 }
  0xa1   : > { %v471_v34 = vadd.f32 %v1447_v33, %v470_v32 }
  0xa3   : > { %v526_v36 = vmul.f32 0.01, %v471_v34  ;;  %vm510_vm1 = vcmp.gt.f32.partialorder %v471_v34, 0.0 }
  0xa5   : > { %v542_v39 = vsel %vm510_vm1, %v471_v34, %v526_v36  ;;  %v1165_v34 = vld [vmem:[%s1633_s5 + $0x8] sm:$0xff]  ;;  %v1164_v36 = vld [vmem:[%s1633_s5] sm:$0xff] }
  0xa6   : > { %750 = vmatpush.bf16.msra.mxu2 %v1165_v34 }
  0xa8   : > { %v472_v35 = vpop.f32.mrf.mxu0 }
  0xa9   : > { %v473_v37 = vadd.f32 %v1447_v33, %v472_v35 }
  0xaa   : > { %751 = vmatpush.bf16.msra.mxu2 %v1164_v36 }
  0xab   : > { %vm511_vm2 = vcmp.gt.f32.partialorder %v473_v37, 0.0  ;;  %v527_v38 = vmul.f32 0.01, %v473_v37 }
  0xad   : > { %v543_v40 = vsel %vm511_vm2, %v473_v37, %v527_v38  ;;  %vm675_vm2 = vcmask 261120  }
  0xae   : > { %v558_v41 = vpack.c.bf16 %v543_v40, %v542_v39 }
  0xb0   : > { %v475_v42 = vpop.f32.mrf.mxu0  ;;  %1103 = vmatmul.msk.bf16.vlgmr.msra.gmra.mxu1 %vm436_vm0, %v558_v41 }
  0xb1   : > { %v476_v43 = vadd.f32 %v1447_v33, %v475_v42 }
  0xb3   : > { %v528_v45 = vmul.f32 0.01, %v476_v43  ;;  %vm512_vm3 = vcmp.gt.f32.partialorder %v476_v43, 0.0 }
  0xb5   : > { %v544_v48 = vsel %vm512_vm3, %v476_v43, %v528_v45 }
  0xb8   : > { %v477_v44 = vpop.f32.mrf.mxu0 }
  0xb9   : > { %v478_v46 = vadd.f32 %v1447_v33, %v477_v44  ;;  %v1482_v44 = vld [vmem:[%s1632_s4] ss:$0 sm:$0xff] }
  0xbb   : > { %vm513_vm4 = vcmp.gt.f32.partialorder %v478_v46, 0.0  ;;  %v529_v47 = vmul.f32 0.01, %v478_v46 }
  0xbd   : > { %v545_v49 = vsel %vm513_vm4, %v478_v46, %v529_v47 }
  0xbe   : > { %v559_v50 = vpack.c.bf16 %v545_v49, %v544_v48 }
  0xc0   : > { %v480_v51 = vpop.f32.mrf.mxu0  ;;  %1104 = vmatmul.msk.bf16.gmra.mxu1 %vm436_vm0, %v559_v50 }
  0xc1   : > { %v481_v52 = vadd.f32 %v1447_v33, %v480_v51 }
  0xc3   : > { %v530_v54 = vmul.f32 0.01, %v481_v52  ;;  %vm514_vm5 = vcmp.gt.f32.partialorder %v481_v52, 0.0 }
  0xc5   : > { %v546_v57 = vsel %vm514_vm5, %v481_v52, %v530_v54 }
  0xc8   : > { %v482_v53 = vpop.f32.mrf.mxu0 }
  0xc9   : > { %v483_v55 = vadd.f32 %v1447_v33, %v482_v53 }
  0xcb   : > { %vm515_vm6 = vcmp.gt.f32.partialorder %v483_v55, 0.0  ;;  %v531_v56 = vmul.f32 0.01, %v483_v55 }
  0xcd   : > { %v547_v58 = vsel %vm515_vm6, %v483_v55, %v531_v56 }
  0xce   : > { %v560_v59 = vpack.c.bf16 %v547_v58, %v546_v57 }
  0xd0   : > { %v485_v60 = vpop.f32.mrf.mxu0  ;;  %1105 = vmatmul.msk.bf16.gmra.mxu1 %vm436_vm0, %v560_v59 }
  0xd1   : > { %v486_v61 = vadd.f32 %v1447_v33, %v485_v60 }
  0xd3   : > { %v532_v63 = vmul.f32 0.01, %v486_v61  ;;  %vm516_vm7 = vcmp.gt.f32.partialorder %v486_v61, 0.0 }
  0xd5   : > { %v548_v2 = vsel %vm516_vm7, %v486_v61, %v532_v63 }
  0xd8   : > { %v487_v62 = vpop.f32.mrf.mxu0 }
  0xd9   : > { %v488_v0 = vadd.f32 %v1447_v33, %v487_v62 }
  0xdb   : > { %vm517_vm8 = vcmp.gt.f32.partialorder %v488_v0, 0.0  ;;  %v533_v1 = vmul.f32 0.01, %v488_v0 }
  0xdd   : > { %v549_v3 = vsel %vm517_vm8, %v488_v0, %v533_v1 }
  0xde   : > { %v561_v4 = vpack.c.bf16 %v549_v3, %v548_v2 }
  0xe0   : > { %v490_v5 = vpop.f32.mrf.mxu0  ;;  %1106 = vmatmul.msk.bf16.gmra.mxu1 %vm436_vm0, %v561_v4 }
  0xe1   : > { %v491_v6 = vadd.f32 %v1447_v33, %v490_v5 }
  0xe3   : > { %v534_v8 = vmul.f32 0.01, %v491_v6  ;;  %vm518_vm9 = vcmp.gt.f32.partialorder %v491_v6, 0.0 }
  0xe5   : > { %v550_v11 = vsel %vm518_vm9, %v491_v6, %v534_v8 }
  0xe8   : > { %v492_v7 = vpop.f32.mrf.mxu0 }
  0xe9   : > { %v493_v9 = vadd.f32 %v1447_v33, %v492_v7 }
  0xeb   : > { %vm519_vm10 = vcmp.gt.f32.partialorder %v493_v9, 0.0  ;;  %v535_v10 = vmul.f32 0.01, %v493_v9 }
  0xed   : > { %v551_v12 = vsel %vm519_vm10, %v493_v9, %v535_v10 }
  0xee   : > { %v562_v13 = vpack.c.bf16 %v551_v12, %v550_v11 }
  0xf0   : > { %v495_v14 = vpop.f32.mrf.mxu0  ;;  %1107 = vmatmul.msk.bf16.gmra.mxu1 %vm436_vm0, %v562_v13 }
  0xf1   : > { %v496_v15 = vadd.f32 %v1447_v33, %v495_v14 }
  0xf3   : > { %v536_v17 = vmul.f32 0.01, %v496_v15  ;;  %vm520_vm11 = vcmp.gt.f32.partialorder %v496_v15, 0.0 }
  0xf5   : > { %v552_v20 = vsel %vm520_vm11, %v496_v15, %v536_v17  ;;  %v1169_v15 = vld [vmem:[%s1635_s7 + $0x18] sm:$0xff] }
  0xf6   : > { %881 = vmatpush.bf16.msra.mxu3 %v1169_v15 }
  0xf8   : > { %v497_v16 = vpop.f32.mrf.mxu0 }
  0xf9   : > { %v498_v18 = vadd.f32 %v1447_v33, %v497_v16 }
  0xfb   : > { %vm521_vm12 = vcmp.gt.f32.partialorder %v498_v18, 0.0  ;;  %v537_v19 = vmul.f32 0.01, %v498_v18 }
  0xfd   : > { %v553_v21 = vsel %vm521_vm12, %v498_v18, %v537_v19  ;;  %v1168_v18 = vld [vmem:[%s1635_s7 + $0x10] sm:$0xff]  ;;  %v1167_v19 = vld [vmem:[%s1635_s7 + $0x8] sm:$0xff] }
  0xfe   : > { %v563_v22 = vpack.c.bf16 %v553_v21, %v552_v20  ;;  %882 = vmatpush.bf16.msra.mxu3 %v1168_v18 }
 0x100   : > { %v500_v23 = vpop.f32.mrf.mxu0  ;;  %1108 = vmatmul.msk.bf16.gmra.mxu1 %vm436_vm0, %v563_v22  ;;  %v1166_v22 = vld [vmem:[%s1635_s7] sm:$0xff] }
 0x101   : > { %v501_v24 = vadd.f32 %v1447_v33, %v500_v23 }
 0x102   : > { %883 = vmatpush.bf16.msra.mxu3 %v1167_v19 }
 0x103   : > { %v538_v26 = vmul.f32 0.01, %v501_v24  ;;  %vm522_vm13 = vcmp.gt.f32.partialorder %v501_v24, 0.0 }
 0x105   : > { %v554_v29 = vsel %vm522_vm13, %v501_v24, %v538_v26 }
 0x106   : > { %884 = vmatpush.bf16.msra.mxu3 %v1166_v22 }
 0x108   : > { %v502_v25 = vpop.f32.mrf.mxu0 }
 0x109   : > { %v503_v27 = vadd.f32 %v1447_v33, %v502_v25  ;;  %v1214_v25 = vld [vmem:[%s1634_s6] ss:$0 sm:$0xff] }
 0x10b   : > { %vm523_vm14 = vcmp.gt.f32.partialorder %v503_v27, 0.0  ;;  %v539_v28 = vmul.f32 0.01, %v503_v27 }
 0x10d   : > { %v555_v30 = vsel %vm523_vm14, %v503_v27, %v539_v28 }
 0x10e   : > { %v564_v31 = vpack.c.bf16 %v555_v30, %v554_v29 }
 0x110   : > { %v505_v32 = vpop.f32.mrf.mxu0  ;;  %1109 = vmatmul.msk.bf16.gmra.mxu1 %vm436_vm0, %v564_v31 }
 0x111   : > { %v506_v35 = vadd.f32 %v1447_v33, %v505_v32 }
 0x113   : > { %v540_v38 = vmul.f32 0.01, %v506_v35  ;;  %vm524_vm15 = vcmp.gt.f32.partialorder %v506_v35, 0.0 }
 0x115   : > { %v556_v41 = vsel %vm524_vm15, %v506_v35, %v540_v38 }
 0x118   : > { %v507_v37 = vpop.f32.mrf.mxu0 }
 0x119   : > { %v508_v39 = vadd.f32 %v1447_v33, %v507_v37 }
 0x11b   : > { %vm525_vm1 = vcmp.gt.f32.partialorder %v508_v39, 0.0  ;;  %v541_v40 = vmul.f32 0.01, %v508_v39 }
 0x11d   : > { %v557_v42 = vsel %vm525_vm1, %v508_v39, %v541_v40 }
 0x11e   : > { %v565_v43 = vpack.c.bf16 %v557_v42, %v556_v41 }
 0x120   : > { %1110 = vmatmul.msk.bf16.gmra.mxu1 %vm436_vm0, %v565_v43 }
 0x12d   : > { %v635_v33 = vpop.f32.mrf.mxu1 }
 0x12e   : > { %v636_v45 = vadd.f32 %v1482_v44, %v635_v33 }
 0x130   : > { %676 = vst.msk [vmem:[%s1489_s29] sm:$0xff] %vm675_vm2, %v636_v45 }
 0x135   : > { %v637_v46 = vpop.f32.mrf.mxu1 }
 0x136   : > { %v638_v47 = vadd.f32 %v1482_v44, %v637_v46 }
 0x138   : > { %677 = vst.msk [vmem:[%s1489_s29 + $0x8] sm:$0xff] %vm675_vm2, %v638_v47  ;;  %v692_v48 = vpack.c.bf16 %v638_v47, %v636_v45 }
 0x13a   : > { %1119 = vmatmul.msk.bf16.vlgmr.msra.gmra.mxu2 %vm675_vm2, %v692_v48 }
 0x13d   : > { %v640_v49 = vpop.f32.mrf.mxu1 }
 0x13e   : > { %v641_v50 = vadd.f32 %v1482_v44, %v640_v49 }
 0x140   : > { %678 = vst.msk [vmem:[%s1489_s29 + $0x10] sm:$0xff] %vm675_vm2, %v641_v50 }
 0x145   : > { %v642_v51 = vpop.f32.mrf.mxu1 }
 0x146   : > { %v643_v52 = vadd.f32 %v1482_v44, %v642_v51 }
 0x148   : > { %679 = vst.msk [vmem:[%s1489_s29 + $0x18] sm:$0xff] %vm675_vm2, %v643_v52  ;;  %v693_v53 = vpack.c.bf16 %v643_v52, %v641_v50 }
 0x14a   : > { %1120 = vmatmul.msk.bf16.gmra.mxu2 %vm675_vm2, %v693_v53 }
 0x14d   : > { %v645_v54 = vpop.f32.mrf.mxu1 }
 0x14e   : > { %v646_v55 = vadd.f32 %v1482_v44, %v645_v54 }
 0x150   : > { %680 = vst.msk [vmem:[%s1489_s29 + $0x20] sm:$0xff] %vm675_vm2, %v646_v55 }
 0x155   : > { %v647_v56 = vpop.f32.mrf.mxu1 }
 0x156   : > { %v648_v57 = vadd.f32 %v1482_v44, %v647_v56 }
 0x158   : > { %681 = vst.msk [vmem:[%s1489_s29 + $0x28] sm:$0xff] %vm675_vm2, %v648_v57  ;;  %v694_v58 = vpack.c.bf16 %v648_v57, %v646_v55 }
 0x15a   : > { %1121 = vmatmul.msk.bf16.gmra.mxu2 %vm675_vm2, %v694_v58 }
 0x15d   : > { %v650_v59 = vpop.f32.mrf.mxu1 }
 0x15e   : > { %v651_v60 = vadd.f32 %v1482_v44, %v650_v59 }
 0x160   : > { %682 = vst.msk [vmem:[%s1489_s29 + $0x30] sm:$0xff] %vm675_vm2, %v651_v60 }
 0x165   : > { %v652_v61 = vpop.f32.mrf.mxu1 }
 0x166   : > { %v653_v62 = vadd.f32 %v1482_v44, %v652_v61 }
 0x168   : > { %683 = vst.msk [vmem:[%s1489_s29 + $0x38] sm:$0xff] %vm675_vm2, %v653_v62  ;;  %v695_v63 = vpack.c.bf16 %v653_v62, %v651_v60 }
 0x16a   : > { %1122 = vmatmul.msk.bf16.gmra.mxu2 %vm675_vm2, %v695_v63 }
 0x16d   : > { %v655_v0 = vpop.f32.mrf.mxu1 }
 0x16e   : > { %v656_v1 = vadd.f32 %v1482_v44, %v655_v0 }
 0x170   : > { %684 = vst.msk [vmem:[%s1489_s29 + $0x40] sm:$0xff] %vm675_vm2, %v656_v1 }
 0x175   : > { %v657_v2 = vpop.f32.mrf.mxu1 }
 0x176   : > { %v658_v3 = vadd.f32 %v1482_v44, %v657_v2 }
 0x178   : > { %685 = vst.msk [vmem:[%s1489_s29 + $0x48] sm:$0xff] %vm675_vm2, %v658_v3  ;;  %v696_v4 = vpack.c.bf16 %v658_v3, %v656_v1 }
 0x17a   : > { %1123 = vmatmul.msk.bf16.gmra.mxu2 %vm675_vm2, %v696_v4 }
 0x17d   : > { %v660_v5 = vpop.f32.mrf.mxu1 }
 0x17e   : > { %v661_v6 = vadd.f32 %v1482_v44, %v660_v5 }
 0x180   : > { %686 = vst.msk [vmem:[%s1489_s29 + $0x50] sm:$0xff] %vm675_vm2, %v661_v6 }
 0x185   : > { %v662_v7 = vpop.f32.mrf.mxu1 }
 0x186   : > { %v663_v8 = vadd.f32 %v1482_v44, %v662_v7 }
 0x188   : > { %687 = vst.msk [vmem:[%s1489_s29 + $0x58] sm:$0xff] %vm675_vm2, %v663_v8  ;;  %v697_v9 = vpack.c.bf16 %v663_v8, %v661_v6 }
 0x18a   : > { %1124 = vmatmul.msk.bf16.gmra.mxu2 %vm675_vm2, %v697_v9 }
 0x18d   : > { %v665_v10 = vpop.f32.mrf.mxu1 }
 0x18e   : > { %v666_v11 = vadd.f32 %v1482_v44, %v665_v10 }
 0x190   : > { %688 = vst.msk [vmem:[%s1489_s29 + $0x60] sm:$0xff] %vm675_vm2, %v666_v11 }
 0x195   : > { %v667_v12 = vpop.f32.mrf.mxu1 }
 0x196   : > { %v668_v13 = vadd.f32 %v1482_v44, %v667_v12 }
 0x198   : > { %689 = vst.msk [vmem:[%s1489_s29 + $0x68] sm:$0xff] %vm675_vm2, %v668_v13  ;;  %v698_v14 = vpack.c.bf16 %v668_v13, %v666_v11 }
 0x19a   : > { %1125 = vmatmul.msk.bf16.gmra.mxu2 %vm675_vm2, %v698_v14 }
 0x19d   : > { %v670_v16 = vpop.f32.mrf.mxu1 }
 0x19e   : > { %v671_v17 = vadd.f32 %v1482_v44, %v670_v16 }
 0x1a0   : > { %690 = vst.msk [vmem:[%s1489_s29 + $0x70] sm:$0xff] %vm675_vm2, %v671_v17 }
 0x1a5   : > { %v672_v20 = vpop.f32.mrf.mxu1 }
 0x1a6   : > { %v673_v21 = vadd.f32 %v1482_v44, %v672_v20 }
 0x1a8   : > { %691 = vst.msk [vmem:[%s1489_s29 + $0x78] sm:$0xff] %vm675_vm2, %v673_v21  ;;  %v699_v23 = vpack.c.bf16 %v673_v21, %v671_v17  ;;  %s359_s29 = sand.u32 1, %s1270_s14   ;;  %v1215_v17 = vld [vmem:[%s1636_s8] ss:$0 sm:$0xff] }
 0x1a9   : > { %s1058_s27 = sshll.u32 %s359_s29, 7 }
 0x1aa   : > { %1126 = vmatmul.msk.bf16.gmra.mxu2 %vm675_vm2, %v699_v23  ;;  %s1576_s11 = scalar_lea.vmem [#allocation2], %s1058_s27  ;;  %s948_s27 = scalar_lea.sflag [#allocation3], %s359_s29 }
 0x1ab   : > { %s964_s26 = sshll.u32 %s1576_s11, 4  ;;  %s965_s26 = int_to_ptr.vmem [resolvable:$true] %s964_s26 }
 0x1bd   : > { %v753_v24 = vpop.f32.mrf.mxu2 }
 0x1be   : > { %v754_v26 = vadd.f32 %v1214_v25, %v753_v24 }
 0x1c0   : > { %v793_v29 = vmax.f32 %v754_v26, 0.0 }
 0x1c5   : > { %v755_v27 = vpop.f32.mrf.mxu2 }
 0x1c6   : > { %v756_v28 = vadd.f32 %v1214_v25, %v755_v27 }
 0x1c8   : > { %v794_v30 = vmax.f32 %v756_v28, 0.0 }
 0x1ca   : > { %v809_v31 = vpack.c.bf16 %v794_v30, %v793_v29 }
 0x1cc   : > { %1143 = vmatmul.msk.bf16.vlgmr.msra.gmra.mxu3 %vm436_vm0, %v809_v31 }
 0x1cd   : > { %v758_v32 = vpop.f32.mrf.mxu2 }
 0x1ce   : > { %v759_v34 = vadd.f32 %v1214_v25, %v758_v32 }
 0x1d0   : > { %v795_v37 = vmax.f32 %v759_v34, 0.0 }
 0x1d5   : > { %v760_v35 = vpop.f32.mrf.mxu2 }
 0x1d6   : > { %v761_v36 = vadd.f32 %v1214_v25, %v760_v35 }
 0x1d8   : > { %v796_v38 = vmax.f32 %v761_v36, 0.0 }
 0x1da   : > { %v810_v39 = vpack.c.bf16 %v796_v38, %v795_v37 }
 0x1dc   : > { %1144 = vmatmul.msk.bf16.gmra.mxu3 %vm436_vm0, %v810_v39 }
 0x1dd   : > { %v763_v40 = vpop.f32.mrf.mxu2 }
 0x1de   : > { %v764_v41 = vadd.f32 %v1214_v25, %v763_v40 }
 0x1e0   : > { %v797_v44 = vmax.f32 %v764_v41, 0.0 }
 0x1e5   : > { %v765_v42 = vpop.f32.mrf.mxu2 }
 0x1e6   : > { %v766_v43 = vadd.f32 %v1214_v25, %v765_v42 }
 0x1e8   : > { %v798_v33 = vmax.f32 %v766_v43, 0.0 }
 0x1ea   : > { %v811_v45 = vpack.c.bf16 %v798_v33, %v797_v44 }
 0x1ec   : > { %1145 = vmatmul.msk.bf16.gmra.mxu3 %vm436_vm0, %v811_v45 }
 0x1ed   : > { %v768_v46 = vpop.f32.mrf.mxu2 }
 0x1ee   : > { %v769_v47 = vadd.f32 %v1214_v25, %v768_v46 }
 0x1f0   : > { %v799_v50 = vmax.f32 %v769_v47, 0.0 }
 0x1f5   : > { %v770_v48 = vpop.f32.mrf.mxu2 }
 0x1f6   : > { %v771_v49 = vadd.f32 %v1214_v25, %v770_v48 }
 0x1f8   : > { %v800_v51 = vmax.f32 %v771_v49, 0.0 }
 0x1fa   : > { %v812_v52 = vpack.c.bf16 %v800_v51, %v799_v50 }
 0x1fc   : > { %1146 = vmatmul.msk.bf16.gmra.mxu3 %vm436_vm0, %v812_v52 }
 0x1fd   : > { %v773_v53 = vpop.f32.mrf.mxu2 }
 0x1fe   : > { %v774_v54 = vadd.f32 %v1214_v25, %v773_v53 }
 0x200   : > { %v801_v57 = vmax.f32 %v774_v54, 0.0 }
 0x205   : > { %v775_v55 = vpop.f32.mrf.mxu2 }
 0x206   : > { %v776_v56 = vadd.f32 %v1214_v25, %v775_v55 }
 0x208   : > { %v802_v58 = vmax.f32 %v776_v56, 0.0 }
 0x20a   : > { %v813_v59 = vpack.c.bf16 %v802_v58, %v801_v57 }
 0x20c   : > { %1147 = vmatmul.msk.bf16.gmra.mxu3 %vm436_vm0, %v813_v59 }
 0x20d   : > { %v778_v60 = vpop.f32.mrf.mxu2 }
 0x20e   : > { %v779_v61 = vadd.f32 %v1214_v25, %v778_v60 }
 0x210   : > { %v803_v0 = vmax.f32 %v779_v61, 0.0 }
 0x215   : > { %v780_v62 = vpop.f32.mrf.mxu2 }
 0x216   : > { %v781_v63 = vadd.f32 %v1214_v25, %v780_v62 }
 0x218   : > { %v804_v1 = vmax.f32 %v781_v63, 0.0 }
 0x21a   : > { %v814_v2 = vpack.c.bf16 %v804_v1, %v803_v0 }
 0x21c   : > { %1148 = vmatmul.msk.bf16.gmra.mxu3 %vm436_vm0, %v814_v2 }
 0x21d   : > { %v783_v3 = vpop.f32.mrf.mxu2 }
 0x21e   : > { %v784_v4 = vadd.f32 %v1214_v25, %v783_v3 }
 0x220   : > { %v805_v7 = vmax.f32 %v784_v4, 0.0 }
 0x225   : > { %v785_v5 = vpop.f32.mrf.mxu2 }
 0x226   : > { %v786_v6 = vadd.f32 %v1214_v25, %v785_v5 }
 0x228   : > { %v806_v8 = vmax.f32 %v786_v6, 0.0 }
 0x22a   : > { %v815_v9 = vpack.c.bf16 %v806_v8, %v805_v7 }
 0x22c   : > { %1149 = vmatmul.msk.bf16.gmra.mxu3 %vm436_vm0, %v815_v9 }
 0x22d   : > { %v788_v10 = vpop.f32.mrf.mxu2 }
 0x22e   : > { %v789_v11 = vadd.f32 %v1214_v25, %v788_v10 }
 0x230   : > { %v807_v14 = vmax.f32 %v789_v11, 0.0 }
 0x235   : > { %v790_v12 = vpop.f32.mrf.mxu2 }
 0x236   : > { %v791_v13 = vadd.f32 %v1214_v25, %v790_v12 }
 0x238   : > { %v808_v15 = vmax.f32 %v791_v13, 0.0 }
 0x23a   : > { %v816_v16 = vpack.c.bf16 %v808_v15, %v807_v14 }
 0x23c   : > { %1150 = vmatmul.msk.bf16.gmra.mxu3 %vm436_vm0, %v816_v16 }
 0x24f   : > { %v886_v18 = vpop.f32.mrf.mxu3 }
 0x250   : > { %v887_v19 = vadd.f32 %v1215_v17, %v886_v18 }
 0x252   : > { %926 = vst [vmem:[%s1576_s11] sm:$0xff] %v887_v19 }
 0x257   : > { %v888_v20 = vpop.f32.mrf.mxu3 }
 0x258   : > { %v889_v21 = vadd.f32 %v1215_v17, %v888_v20 }
 0x25a   : > { %927 = vst [vmem:[%s1576_s11 + $0x8] sm:$0xff] %v889_v21 }
 0x25f   : > { %v891_v22 = vpop.f32.mrf.mxu3 }
 0x260   : > { %v892_v23 = vadd.f32 %v1215_v17, %v891_v22 }
 0x262   : > { %928 = vst [vmem:[%s1576_s11 + $0x10] sm:$0xff] %v892_v23 }
 0x267   : > { %v893_v24 = vpop.f32.mrf.mxu3 }
 0x268   : > { %v894_v25 = vadd.f32 %v1215_v17, %v893_v24 }
 0x26a   : > { %929 = vst [vmem:[%s1576_s11 + $0x18] sm:$0xff] %v894_v25 }
 0x26f   : > { %v896_v26 = vpop.f32.mrf.mxu3 }
 0x270   : > { %v897_v27 = vadd.f32 %v1215_v17, %v896_v26 }
 0x272   : > { %930 = vst [vmem:[%s1576_s11 + $0x20] sm:$0xff] %v897_v27 }
 0x277   : > { %v898_v28 = vpop.f32.mrf.mxu3 }
 0x278   : > { %v899_v29 = vadd.f32 %v1215_v17, %v898_v28 }
 0x27a   : > { %931 = vst [vmem:[%s1576_s11 + $0x28] sm:$0xff] %v899_v29 }
 0x27f   : > { %v901_v30 = vpop.f32.mrf.mxu3 }
 0x280   : > { %v902_v31 = vadd.f32 %v1215_v17, %v901_v30 }
 0x282   : > { %932 = vst [vmem:[%s1576_s11 + $0x30] sm:$0xff] %v902_v31 }
 0x287   : > { %v903_v32 = vpop.f32.mrf.mxu3 }
 0x288   : > { %v904_v34 = vadd.f32 %v1215_v17, %v903_v32 }
 0x28a   : > { %933 = vst [vmem:[%s1576_s11 + $0x38] sm:$0xff] %v904_v34 }
 0x28f   : > { %v906_v35 = vpop.f32.mrf.mxu3 }
 0x290   : > { %v907_v36 = vadd.f32 %v1215_v17, %v906_v35 }
 0x292   : > { %934 = vst [vmem:[%s1576_s11 + $0x40] sm:$0xff] %v907_v36 }
 0x297   : > { %v908_v37 = vpop.f32.mrf.mxu3 }
 0x298   : > { %v909_v38 = vadd.f32 %v1215_v17, %v908_v37 }
 0x29a   : > { %935 = vst [vmem:[%s1576_s11 + $0x48] sm:$0xff] %v909_v38 }
 0x29f   : > { %v911_v39 = vpop.f32.mrf.mxu3 }
 0x2a0   : > { %v912_v40 = vadd.f32 %v1215_v17, %v911_v39 }
 0x2a2   : > { %936 = vst [vmem:[%s1576_s11 + $0x50] sm:$0xff] %v912_v40 }
 0x2a7   : > { %v913_v41 = vpop.f32.mrf.mxu3 }
 0x2a8   : > { %v914_v42 = vadd.f32 %v1215_v17, %v913_v41 }
 0x2aa   : > { %937 = vst [vmem:[%s1576_s11 + $0x58] sm:$0xff] %v914_v42 }
 0x2af   : > { %v916_v43 = vpop.f32.mrf.mxu3 }
 0x2b0   : > { %v917_v44 = vadd.f32 %v1215_v17, %v916_v43 }
 0x2b2   : > { %938 = vst [vmem:[%s1576_s11 + $0x60] sm:$0xff] %v917_v44 }
 0x2b7   : > { %v918_v33 = vpop.f32.mrf.mxu3 }
 0x2b8   : > { %v919_v45 = vadd.f32 %v1215_v17, %v918_v33 }
 0x2ba   : > { %939 = vst [vmem:[%s1576_s11 + $0x68] sm:$0xff] %v919_v45 }
 0x2bf   : > { %v921_v46 = vpop.f32.mrf.mxu3 }
 0x2c0   : > { %v922_v47 = vadd.f32 %v1215_v17, %v921_v46 }
 0x2c2   : > { %940 = vst [vmem:[%s1576_s11 + $0x70] sm:$0xff] %v922_v47 }
 0x2c7   : > { %v923_v48 = vpop.f32.mrf.mxu3 }
 0x2c8   : > { %v924_v49 = vadd.f32 %v1215_v17, %v923_v48 }
 0x2ca   : > { %941 = vst [vmem:[%s1576_s11 + $0x78] sm:$0xff] %v924_v49 }
 0x2cb   : > { %1243 = shalt.err (!%p1240_p3)
}
 0x2cc   : > { %s1280_s29 = smov 128   ;;  %s1281_s11 = smov 8  }
 0x2cd   : > { %1171 = dma.vmem_to_hbm [thread:$0]  (%p1375_p5), %s965_s26, 2048, %s967_s28, %s948_s27, %s1280_s29, %s1280_s29, %s1281_s11  }
 0x2ce PF: > { %p1177_p4 = scmp.ge.s32.totalorder %s1278_s16, 2  ;;  %s989_s21 = sand.u32 1, %s1266_s13  }
 0x2cf   : > { %s990_s18 = scalar_lea.sflag [#allocation3], %s989_s21 }
 0x2d0   : > { %p1174_p7 = pnand %p1177_p4, %p1379_p6 }
 0x2d2   : > { %p1175_p8 = pneg %p1174_p7 }
 0x2d4   : > { %1261 = dma.done.wait (%p1175_p8), %s990_s18, 2048  }
 0x2d5   : > { %1263 = vsyncadd (%p1175_p8), %s990_s18, 4294965248  ;;  %p21_p9 = scmp.ge.s32.totalorder %s1362_s19, 4   ;;  %s1641_s13 = smov %s1270_s14 }
 0x2d6   : > { %s1642_s14 = smov %s1274_s15  ;;  %s1643_s15 = smov %s1373_s22 }
 0x2d7   : > { %s1644_s16 = smov %s1362_s19  ;;  %23 = sbr.rel (!%p21_p9) target bundleno = 3 (0x3), region = 103 }
 0x2dc   :  { %996 = vsyncpa [#allocation3], 1 }
 0x2dd   :  { %998 = vsyncpa [#allocation3 + $0x1], 1 }

</bundles_post_ra>
